<compile_context>
chip_gen: v6e
topology: v6e:2x2x1
jax: 0.10.0
libtpu: 0.0.40
codegen_flags: <defaults>
</compile_context>

<pallas_src>
import functools

import jax
import jax.numpy as jnp
from jax.experimental import pallas as pl
from jax.experimental.pallas import tpu as pltpu

_LANE = 128
_SUBLANE = 8


def _round_up(x, m):
    return ((x + m - 1) // m) * m


def _granule(dtype):
    """Sublane packing granule: f32 -> 8, bf16 -> 16, 1-byte dtypes -> 32."""
    return max(_SUBLANE, 32 // jnp.dtype(dtype).itemsize)


def _vmem_capacity_bytes():
    """Per-core VMEM capacity; conservative v7x per-TC figure if unknown."""
    try:
        cap = int(getattr(pltpu.get_tpu_info(), "vmem_capacity_bytes", 0))
        if cap > 0:
            return cap
    except Exception:
        pass
    return 64 << 20  # v7x per-TensorCore VMEM — the tightest generation


# ---------------------------------------------------------------------------
# Fused path: the entire MLP in one pallas_call; weights stay VMEM-resident.
# ---------------------------------------------------------------------------
def _fused_mlp_kernel(*refs, num_layers):
    """refs = (x, w0, b0, ..., w{L-1}, b{L-1}, out) for one TM-row tile.

    h = x ; for each layer: h = h @ W + b (f32 MXU accumulation); ReLU on all
    but the last layer.  Inter-layer activations are carried in the streaming
    (compute) dtype; biases are f32 so the epilogue is a cast-free f32 add.
    """
    x_ref = refs[0]
    o_ref = refs[1 + 2 * num_layers]
    act_dtype = x_ref.dtype

    h = x_ref[...]
    for i in range(num_layers):
        w_ref = refs[1 + 2 * i]
        b_ref = refs[2 + 2 * i]
        y = jnp.dot(h, w_ref[...], preferred_element_type=jnp.float32)
        y = y + b_ref[...]  # (1, out) f32 bias broadcasts over the rows
        if i < num_layers - 1:
            h = jnp.maximum(y, 0.0).astype(act_dtype)
        else:
            h = y
    o_ref[...] = h.astype(o_ref.dtype)


def _choose_tm(M, in_pad0, out_pad_last, max_pad, resident_bytes, budget_bytes,
               act_bytes, out_bytes, x_buffers, row_align, tm_max):
    """Row tile TM (MXU/sublane aligned) within the VMEM budget, or None if the
    resident-weights design does not fit at all."""
    # Per-row streaming footprint: x tile (x_buffers-deep), double-buffered
    # output tile, plus the live f32 matmul result + compute-dtype activation.
    per_row = (x_buffers * in_pad0 * act_bytes
               + 2 * out_pad_last * out_bytes
               + max_pad * (4 + act_bytes))
    avail = budget_bytes - resident_bytes
    if avail < per_row * row_align:
        return None  # weights cannot be fully VMEM-resident -> fallback path
    tm = min(int(avail // per_row), tm_max)
    # MXU-friendly alignment (256 on v6e/v7x, also fine on v5e); degrade to 128
    # and finally the dtype sublane granule when the budget is tight.
    for align in (256, 128, row_align):
        if tm >= align:
            tm = (tm // align) * align
            break
    # Don't over-pad small M: shrink the tile to the rounded real row count.
    tm = min(tm, _round_up(M, row_align))
    return max(tm, row_align)


def _fused_call(x_p, flat_params, in_pads, out_pads, *, tm, num_layers,
                out_dtype, vmem_limit, x_buffers, use_buffered):
    m_pad = x_p.shape[0]

    def _spec(shape, index_map, buffers):
        if use_buffered and buffers is not None:
            return pl.BlockSpec(shape, index_map,
                                pipeline_mode=pl.Buffered(buffers))
        return pl.BlockSpec(shape, index_map)

    # x/out tiled over rows; every weight/bias uses a constant index_map so it
    # is DMA'd once and stays VMEM-resident (single-buffered when supported).
    in_specs = [_spec((tm, in_pads[0]), lambda i: (i, 0),
                      x_buffers if x_buffers != 2 else None)]
    for ip, op in zip(in_pads, out_pads):
        in_specs.append(_spec((ip, op), lambda i: (0, 0), 1))
        in_specs.append(_spec((1, op), lambda i: (0, 0), 1))
    out_spec = pl.BlockSpec((tm, out_pads[-1]), lambda i: (i, 0))

    flops = 2 * m_pad * sum(ip * op for ip, op in zip(in_pads, out_pads))
    bytes_accessed = (x_p.size * x_p.dtype.itemsize
                      + m_pad * out_pads[-1] * jnp.dtype(out_dtype).itemsize
                      + sum(int(a.size) * a.dtype.itemsize for a in flat_params))

    kernel = functools.partial(_fused_mlp_kernel, num_layers=num_layers)
    return pl.pallas_call(
        kernel,
        out_shape=jax.ShapeDtypeStruct((m_pad, out_pads[-1]), out_dtype),
        grid_spec=pltpu.PrefetchScalarGridSpec(
            num_scalar_prefetch=0,
            grid=(m_pad // tm,),
            in_specs=in_specs,
            out_specs=out_spec,
        ),
        compiler_params=pltpu.CompilerParams(
            dimension_semantics=("parallel",),  # row tiles split across TCs on v7x
            vmem_limit_bytes=vmem_limit,
        ),
        cost_estimate=pl.CostEstimate(
            flops=flops, transcendentals=0, bytes_accessed=bytes_accessed),
    )(x_p, *flat_params)


# ---------------------------------------------------------------------------
# Guarded fallback: per-layer (M, N, K)-tiled matmul + bias (+ReLU).
# Used when the resident-weights fused design does not fit VMEM (v7x first).
# ---------------------------------------------------------------------------
def _linear_kernel(x_ref, w_ref, b_ref, o_ref, acc_ref, *, relu):
    @pl.when(pl.program_id(2) == 0)
    def _():
        acc_ref[...] = jnp.zeros_like(acc_ref)
    acc_ref[...] += jnp.dot(x_ref[...], w_ref[...],
                            preferred_element_type=jnp.float32)

    @pl.when(pl.program_id(2) == pl.num_programs(2) - 1)
    def _():
        y = acc_ref[...] + b_ref[...]
        if relu:
            y = jnp.maximum(y, 0.0)
        o_ref[...] = y.astype(o_ref.dtype)


def _pick_tile(dim, cap=512):
    """Largest multiple of 128 that divides `dim` (itself a 128-multiple) <= cap."""
    best, t = _LANE, _LANE
    while t <= min(dim, cap):
        if dim % t == 0:
            best = t
        t += _LANE
    return best


def _linear_layer(x2d, w, b, *, relu, out_dtype, tm, vmem_limit):
    M, K = x2d.shape
    N = w.shape[1]
    tk = _pick_tile(K)
    tn = _pick_tile(N)
    kernel = functools.partial(_linear_kernel, relu=relu)
    return pl.pallas_call(
        kernel,
        out_shape=jax.ShapeDtypeStruct((M, N), out_dtype),
        grid_spec=pltpu.PrefetchScalarGridSpec(
            num_scalar_prefetch=0,
            grid=(M // tm, N // tn, K // tk),
            in_specs=[pl.BlockSpec((tm, tk), lambda i, j, k: (i, k)),
                      pl.BlockSpec((tk, tn), lambda i, j, k: (k, j)),
                      pl.BlockSpec((1, tn), lambda i, j, k: (0, j))],
            out_specs=pl.BlockSpec((tm, tn), lambda i, j, k: (i, j)),
            scratch_shapes=[pltpu.VMEM((tm, tn), jnp.float32)],
        ),
        compiler_params=pltpu.CompilerParams(
            dimension_semantics=("parallel", "parallel", "arbitrary"),
            vmem_limit_bytes=vmem_limit,
        ),
    )(x2d, w, b)


def _mlp_forward_per_layer(x_p, w_pad, b_pad, *, out_dtype, tm, vmem_limit):
    act_dtype = x_p.dtype
    h = x_p
    n = len(w_pad)
    for i, (w, b) in enumerate(zip(w_pad, b_pad)):
        last = (i == n - 1)
        h = _linear_layer(h, w, b, relu=not last,
                          out_dtype=(out_dtype if last else act_dtype),
                          tm=tm, vmem_limit=vmem_limit)
    return h


# ---------------------------------------------------------------------------
# Public wrapper.
# ---------------------------------------------------------------------------
def mlp_forward(x, params, compute_dtype=jnp.float32, out_dtype=None,
                tm_max=1024, x_buffers=2, force_per_layer=False):
    """x: (..., input_dim); params: list of (w (in,out), b (out,)).

    compute_dtype: dtype fed to the MXU (f32 exact; bf16 throughput on all
    generations; fp8 e4m3 is the v7x throughput path). Accumulation is f32.
    x_buffers: pipeline depth of the x row-tile stream (raise to 3 if DMA is
    exposed for very wide first layers / small tiles).
    """
    num_layers = len(params)
    lead_shape = x.shape[:-1]
    in_dim = x.shape[-1]
    out_dim = params[-1][0].shape[1]
    out_dtype = x.dtype if out_dtype is None else out_dtype

    x2d = x.reshape(-1, in_dim)
    M = x2d.shape[0]

    # Zero-pad every feature dim to a multiple of 128 lanes (exact math:
    # padded x cols hit zero W rows, padded W cols get zero bias).
    in_pads = [_round_up(w.shape[0], _LANE) for w, _ in params]
    out_pads = [_round_up(w.shape[1], _LANE) for w, _ in params]

    w_pad, b_pad = [], []
    for (w, b), ip, op in zip(params, in_pads, out_pads):
        w_pad.append(jnp.pad(w, ((0, ip - w.shape[0]),
                                 (0, op - w.shape[1]))).astype(compute_dtype))
        b_pad.append(jnp.pad(b.reshape(1, -1).astype(jnp.float32),
                             ((0, 0), (0, op - b.shape[0]))))

    act_bytes = jnp.dtype(compute_dtype).itemsize
    o_bytes = jnp.dtype(out_dtype).itemsize
    row_align = max(_granule(compute_dtype), _granule(out_dtype))

    # Generation-aware VMEM planning (v5e/v6e: 128 MiB, v7x: 64 MiB per TC).
    cap = _vmem_capacity_bytes()
    budget = max(int(cap * 0.70), 24 << 20)          # planning budget
    vmem_limit = max(int(cap - (4 << 20)), 32 << 20)  # scoped limit we request

    resident = (sum(int(w.size) for w in w_pad) * act_bytes
                + sum(int(b.size) for b in b_pad) * 4)  # single-buffered weights
    max_pad = max(in_pads + out_pads)

    tm = None if force_per_layer else _choose_tm(
        M, in_pads[0], out_pads[-1], max_pad, resident, budget,
        act_bytes, o_bytes, x_buffers, row_align, tm_max)

    if tm is None:
        # Weights cannot be fully VMEM-resident (or forced): per-layer path.
        tm_fb = min(512, _round_up(M, row_align))
        m_pad = _round_up(M, tm_fb)
        x_p = jnp.pad(x2d, ((0, m_pad - M),
                            (0, in_pads[0] - in_dim))).astype(compute_dtype)
        y = _mlp_forward_per_layer(x_p, w_pad, b_pad, out_dtype=out_dtype,
                                   tm=tm_fb, vmem_limit=vmem_limit)
        return y[:M, :out_dim].reshape(lead_shape + (out_dim,))

    m_pad = _round_up(M, tm)
    x_p = jnp.pad(x2d, ((0, m_pad - M),
                        (0, in_pads[0] - in_dim))).astype(compute_dtype)
    flat_params = []
    for wp, bp in zip(w_pad, b_pad):
        flat_params += [wp, bp]

    # Try single-buffered resident weights first; if that configuration is
    # rejected, retry default-buffered; if the fused path cannot compile at all
    # (e.g. VMEM), fall back to the per-layer tiled path.
    y = None
    for use_buffered in (True, False):
        try:
            y = _fused_call(x_p, flat_params, in_pads, out_pads, tm=tm,
                            num_layers=num_layers, out_dtype=out_dtype,
                            vmem_limit=vmem_limit, x_buffers=x_buffers,
                            use_buffered=use_buffered)
            break
        except Exception:  # fall through to the next, safer configuration
            y = None
    if y is None:
        y = _mlp_forward_per_layer(x_p, w_pad, b_pad, out_dtype=out_dtype,
                                   tm=tm, vmem_limit=vmem_limit)

    return y[:M, :out_dim].reshape(lead_shape + (out_dim,))


def init_mlp_params(key, input_dim, hidden_dim, output_dim, num_layers,
                    dtype=jnp.float32):
    """Synthetic params matching nn.Linear shapes: (w (in,out), b (out,))."""
    h = [hidden_dim] * (num_layers - 1)
    dims_in = [input_dim] + h
    dims_out = h + [output_dim]
    params = []
    for n, k in zip(dims_in, dims_out):
        key, kw, kb = jax.random.split(key, 3)
        bound = 1.0 / (n ** 0.5)  # same scale as PyTorch's default init
        w = jax.random.uniform(kw, (n, k), dtype, -bound, bound)
        b = jax.random.uniform(kb, (k,), dtype, -bound, bound)
        params.append((w, b))
    return params


if __name__ == "__main__":
    key = jax.random.PRNGKey(0)
    k_x, k_p = jax.random.split(key)

    batch, seq = 2, 8
    input_dim, hidden_dim, output_dim, num_layers = 32, 32, 16, 3

    x = jax.random.normal(k_x, (batch, seq, input_dim), jnp.float32)
    params = init_mlp_params(k_p, input_dim, hidden_dim, output_dim, num_layers)

    # Pure-JAX reference with PyTorch MLP semantics.
    ref = x.reshape(-1, input_dim)
    for i, (w, b) in enumerate(params):
        ref = ref @ w + b.reshape(1, -1)
        if i < num_layers - 1:
            ref = jnp.maximum(ref, 0.0)
    ref = ref.reshape(batch, seq, output_dim)

    # Fused Pallas MLP, f32 MXU path (matches PyTorch semantics).
    out = mlp_forward(x, params)
    jax.block_until_ready(out)
    assert out.shape == (batch, seq, output_dim)
    assert jnp.allclose(out, ref, atol=1e-5, rtol=1e-5)

    # bf16-fed MXU path (bf16 weights + bf16-streamed activations, f32 accum).
    out_bf16 = mlp_forward(x, params, compute_dtype=jnp.bfloat16)
    jax.block_until_ready(out_bf16)
    assert out_bf16.shape == (batch, seq, output_dim)
    assert jnp.allclose(out_bf16, ref, atol=5e-2, rtol=5e-2)

    # Exercise the guarded per-layer fallback (used when resident weights would
    # not fit the per-TC VMEM budget, e.g. very wide MLPs on v7x).
    out_fb = mlp_forward(x, params, force_per_layer=True)
    jax.block_until_ready(out_fb)
    assert jnp.allclose(out_fb, ref, atol=1e-5, rtol=1e-5)

    print("KERNEL_OK")
</pallas_src>

<mosaic_0001>
module attributes {stable_mosaic.version = 11 : i64} {
  func.func @_fused_mlp_kernel(%arg0: i32, %arg1: memref<16x128xf32, #tpu.memory_space<vmem>>, %arg2: memref<128x128xf32, #tpu.memory_space<vmem>>, %arg3: memref<1x128xf32, #tpu.memory_space<vmem>>, %arg4: memref<128x128xf32, #tpu.memory_space<vmem>>, %arg5: memref<1x128xf32, #tpu.memory_space<vmem>>, %arg6: memref<128x128xf32, #tpu.memory_space<vmem>>, %arg7: memref<1x128xf32, #tpu.memory_space<vmem>>, %arg8: memref<16x128xf32, #tpu.memory_space<vmem>>) attributes {dimension_semantics = [#tpu.dimension_semantics<parallel>], iteration_bounds = array<i64: 1>, scalar_prefetch = 0 : i64, scratch_operands = 0 : i64, tpu.core_type = #tpu.core_type<tc>, window_params = [{transform_indices = @transform_0, window_bounds = array<i64: 16, 128>}, {pipeline_mode = #tpu.pipeline_mode<synchronous>, transform_indices = @transform_1, window_bounds = array<i64: 128, 128>}, {pipeline_mode = #tpu.pipeline_mode<synchronous>, transform_indices = @transform_2, window_bounds = array<i64: 1, 128>}, {pipeline_mode = #tpu.pipeline_mode<synchronous>, transform_indices = @transform_3, window_bounds = array<i64: 128, 128>}, {pipeline_mode = #tpu.pipeline_mode<synchronous>, transform_indices = @transform_4, window_bounds = array<i64: 1, 128>}, {pipeline_mode = #tpu.pipeline_mode<synchronous>, transform_indices = @transform_5, window_bounds = array<i64: 128, 128>}, {pipeline_mode = #tpu.pipeline_mode<synchronous>, transform_indices = @transform_6, window_bounds = array<i64: 1, 128>}, {transform_indices = @transform_7, window_bounds = array<i64: 16, 128>}]} {
    %c0 = arith.constant 0 : index
    %c0_0 = arith.constant 0 : index
    %0 = vector.load %arg1[%c0, %c0_0] : memref<16x128xf32, #tpu.memory_space<vmem>>, vector<16x128xf32>
    %c0_1 = arith.constant 0 : index
    %c0_2 = arith.constant 0 : index
    %1 = vector.load %arg2[%c0_1, %c0_2] : memref<128x128xf32, #tpu.memory_space<vmem>>, vector<128x128xf32>
    %cst = arith.constant dense<0.000000e+00> : vector<16x128xf32>
    %2 = tpu.matmul %0, %1, %cst {dimension_numbers = #tpu.dot_dimension_numbers<[1], [0], [0], [1], [0, 0, 1, 1], [], []>} : vector<16x128xf32>, vector<128x128xf32>, vector<16x128xf32> -> vector<16x128xf32>
    %c0_3 = arith.constant 0 : index
    %c0_4 = arith.constant 0 : index
    %3 = vector.load %arg3[%c0_3, %c0_4] : memref<1x128xf32, #tpu.memory_space<vmem>>, vector<1x128xf32>
    %4 = vector.broadcast %3 : vector<1x128xf32> to vector<16x128xf32>
    %5 = arith.addf %2, %4 : vector<16x128xf32>
    %cst_5 = arith.constant 0.000000e+00 : f32
    %6 = vector.broadcast %cst_5 : f32 to vector<16x128xf32>
    %7 = arith.maximumf %5, %6 : vector<16x128xf32>
    %c0_6 = arith.constant 0 : index
    %c0_7 = arith.constant 0 : index
    %8 = vector.load %arg4[%c0_6, %c0_7] : memref<128x128xf32, #tpu.memory_space<vmem>>, vector<128x128xf32>
    %cst_8 = arith.constant dense<0.000000e+00> : vector<16x128xf32>
    %9 = tpu.matmul %7, %8, %cst_8 {dimension_numbers = #tpu.dot_dimension_numbers<[1], [0], [0], [1], [0, 0, 1, 1], [], []>} : vector<16x128xf32>, vector<128x128xf32>, vector<16x128xf32> -> vector<16x128xf32>
    %c0_9 = arith.constant 0 : index
    %c0_10 = arith.constant 0 : index
    %10 = vector.load %arg5[%c0_9, %c0_10] : memref<1x128xf32, #tpu.memory_space<vmem>>, vector<1x128xf32>
    %11 = vector.broadcast %10 : vector<1x128xf32> to vector<16x128xf32>
    %12 = arith.addf %9, %11 : vector<16x128xf32>
    %cst_11 = arith.constant 0.000000e+00 : f32
    %13 = vector.broadcast %cst_11 : f32 to vector<16x128xf32>
    %14 = arith.maximumf %12, %13 : vector<16x128xf32>
    %c0_12 = arith.constant 0 : index
    %c0_13 = arith.constant 0 : index
    %15 = vector.load %arg6[%c0_12, %c0_13] : memref<128x128xf32, #tpu.memory_space<vmem>>, vector<128x128xf32>
    %cst_14 = arith.constant dense<0.000000e+00> : vector<16x128xf32>
    %16 = tpu.matmul %14, %15, %cst_14 {dimension_numbers = #tpu.dot_dimension_numbers<[1], [0], [0], [1], [0, 0, 1, 1], [], []>} : vector<16x128xf32>, vector<128x128xf32>, vector<16x128xf32> -> vector<16x128xf32>
    %c0_15 = arith.constant 0 : index
    %c0_16 = arith.constant 0 : index
    %17 = vector.load %arg7[%c0_15, %c0_16] : memref<1x128xf32, #tpu.memory_space<vmem>>, vector<1x128xf32>
    %18 = vector.broadcast %17 : vector<1x128xf32> to vector<16x128xf32>
    %19 = arith.addf %16, %18 : vector<16x128xf32>
    %c0_17 = arith.constant 0 : index
    %c0_18 = arith.constant 0 : index
    %20 = vector.load %arg8[%c0_17, %c0_18] : memref<16x128xf32, #tpu.memory_space<vmem>>, vector<16x128xf32>
    tpu.vector_store %arg8[%c0_17, %c0_18], %19 {strides = array<i32>} : memref<16x128xf32, #tpu.memory_space<vmem>>, vector<16x128xf32>,
    return
  }
  func.func @transform_0(%arg0: i32) -> (i32, i32) {
    %c0_i32 = arith.constant 0 : i32
    %c0_i32_0 = arith.constant 0 : i32
    return %arg0, %c0_i32 : i32, i32
  }
  func.func @transform_1(%arg0: i32) -> (i32, i32) {
    %c0_i32 = arith.constant 0 : i32
    %c0_i32_0 = arith.constant 0 : i32
    %c0_i32_1 = arith.constant 0 : i32
    return %c0_i32, %c0_i32_0 : i32, i32
  }
  func.func @transform_2(%arg0: i32) -> (i32, i32) {
    %c0_i32 = arith.constant 0 : i32
    %c0_i32_0 = arith.constant 0 : i32
    %c0_i32_1 = arith.constant 0 : i32
    return %c0_i32, %c0_i32_0 : i32, i32
  }
  func.func @transform_3(%arg0: i32) -> (i32, i32) {
    %c0_i32 = arith.constant 0 : i32
    %c0_i32_0 = arith.constant 0 : i32
    %c0_i32_1 = arith.constant 0 : i32
    return %c0_i32, %c0_i32_0 : i32, i32
  }
  func.func @transform_4(%arg0: i32) -> (i32, i32) {
    %c0_i32 = arith.constant 0 : i32
    %c0_i32_0 = arith.constant 0 : i32
    %c0_i32_1 = arith.constant 0 : i32
    return %c0_i32, %c0_i32_0 : i32, i32
  }
  func.func @transform_5(%arg0: i32) -> (i32, i32) {
    %c0_i32 = arith.constant 0 : i32
    %c0_i32_0 = arith.constant 0 : i32
    %c0_i32_1 = arith.constant 0 : i32
    return %c0_i32, %c0_i32_0 : i32, i32
  }
  func.func @transform_6(%arg0: i32) -> (i32, i32) {
    %c0_i32 = arith.constant 0 : i32
    %c0_i32_0 = arith.constant 0 : i32
    %c0_i32_1 = arith.constant 0 : i32
    return %c0_i32, %c0_i32_0 : i32, i32
  }
  func.func @transform_7(%arg0: i32) -> (i32, i32) {
    %c0_i32 = arith.constant 0 : i32
    %c0_i32_0 = arith.constant 0 : i32
    return %arg0, %c0_i32 : i32, i32
  }
}

module attributes {stable_mosaic.version = 11 : i64} {
  func.func @_fused_mlp_kernel(%arg0: i32, %arg1: memref<16x128xf32, #tpu.memory_space<vmem>>, %arg2: memref<128x128xf32, #tpu.memory_space<vmem>>, %arg3: memref<1x128xf32, #tpu.memory_space<vmem>>, %arg4: memref<128x128xf32, #tpu.memory_space<vmem>>, %arg5: memref<1x128xf32, #tpu.memory_space<vmem>>, %arg6: memref<128x128xf32, #tpu.memory_space<vmem>>, %arg7: memref<1x128xf32, #tpu.memory_space<vmem>>, %arg8: memref<16x128xf32, #tpu.memory_space<vmem>>) attributes {dimension_semantics = [#tpu.dimension_semantics<parallel>], iteration_bounds = array<i64: 1>, scalar_prefetch = 0 : i64, scratch_operands = 0 : i64, tpu.core_type = #tpu.core_type<tc>, window_params = [{transform_indices = @transform_0, window_bounds = array<i64: 16, 128>}, {pipeline_mode = #tpu.pipeline_mode<synchronous>, transform_indices = @transform_1, window_bounds = array<i64: 128, 128>}, {pipeline_mode = #tpu.pipeline_mode<synchronous>, transform_indices = @transform_2, window_bounds = array<i64: 1, 128>}, {pipeline_mode = #tpu.pipeline_mode<synchronous>, transform_indices = @transform_3, window_bounds = array<i64: 128, 128>}, {pipeline_mode = #tpu.pipeline_mode<synchronous>, transform_indices = @transform_4, window_bounds = array<i64: 1, 128>}, {pipeline_mode = #tpu.pipeline_mode<synchronous>, transform_indices = @transform_5, window_bounds = array<i64: 128, 128>}, {pipeline_mode = #tpu.pipeline_mode<synchronous>, transform_indices = @transform_6, window_bounds = array<i64: 1, 128>}, {transform_indices = @transform_7, window_bounds = array<i64: 16, 128>}]} {
    %c0 = arith.constant 0 : index
    %c0_0 = arith.constant 0 : index
    %0 = vector.load %arg1[%c0, %c0_0] : memref<16x128xf32, #tpu.memory_space<vmem>>, vector<16x128xf32>
    %c0_1 = arith.constant 0 : index
    %c0_2 = arith.constant 0 : index
    %1 = vector.load %arg2[%c0_1, %c0_2] : memref<128x128xf32, #tpu.memory_space<vmem>>, vector<128x128xf32>
    %cst = arith.constant dense<0.000000e+00> : vector<16x128xf32>
    %2 = tpu.matmul %0, %1, %cst {dimension_numbers = #tpu.dot_dimension_numbers<[1], [0], [0], [1], [0, 0, 1, 1], [], []>} : vector<16x128xf32>, vector<128x128xf32>, vector<16x128xf32> -> vector<16x128xf32>
    %c0_3 = arith.constant 0 : index
    %c0_4 = arith.constant 0 : index
    %3 = vector.load %arg3[%c0_3, %c0_4] : memref<1x128xf32, #tpu.memory_space<vmem>>, vector<1x128xf32>
    %4 = vector.broadcast %3 : vector<1x128xf32> to vector<16x128xf32>
    %5 = arith.addf %2, %4 : vector<16x128xf32>
    %cst_5 = arith.constant 0.000000e+00 : f32
    %6 = vector.broadcast %cst_5 : f32 to vector<16x128xf32>
    %7 = arith.maximumf %5, %6 : vector<16x128xf32>
    %c0_6 = arith.constant 0 : index
    %c0_7 = arith.constant 0 : index
    %8 = vector.load %arg4[%c0_6, %c0_7] : memref<128x128xf32, #tpu.memory_space<vmem>>, vector<128x128xf32>
    %cst_8 = arith.constant dense<0.000000e+00> : vector<16x128xf32>
    %9 = tpu.matmul %7, %8, %cst_8 {dimension_numbers = #tpu.dot_dimension_numbers<[1], [0], [0], [1], [0, 0, 1, 1], [], []>} : vector<16x128xf32>, vector<128x128xf32>, vector<16x128xf32> -> vector<16x128xf32>
    %c0_9 = arith.constant 0 : index
    %c0_10 = arith.constant 0 : index
    %10 = vector.load %arg5[%c0_9, %c0_10] : memref<1x128xf32, #tpu.memory_space<vmem>>, vector<1x128xf32>
    %11 = vector.broadcast %10 : vector<1x128xf32> to vector<16x128xf32>
    %12 = arith.addf %9, %11 : vector<16x128xf32>
    %cst_11 = arith.constant 0.000000e+00 : f32
    %13 = vector.broadcast %cst_11 : f32 to vector<16x128xf32>
    %14 = arith.maximumf %12, %13 : vector<16x128xf32>
    %c0_12 = arith.constant 0 : index
    %c0_13 = arith.constant 0 : index
    %15 = vector.load %arg6[%c0_12, %c0_13] : memref<128x128xf32, #tpu.memory_space<vmem>>, vector<128x128xf32>
    %cst_14 = arith.constant dense<0.000000e+00> : vector<16x128xf32>
    %16 = tpu.matmul %14, %15, %cst_14 {dimension_numbers = #tpu.dot_dimension_numbers<[1], [0], [0], [1], [0, 0, 1, 1], [], []>} : vector<16x128xf32>, vector<128x128xf32>, vector<16x128xf32> -> vector<16x128xf32>
    %c0_15 = arith.constant 0 : index
    %c0_16 = arith.constant 0 : index
    %17 = vector.load %arg7[%c0_15, %c0_16] : memref<1x128xf32, #tpu.memory_space<vmem>>, vector<1x128xf32>
    %18 = vector.broadcast %17 : vector<1x128xf32> to vector<16x128xf32>
    %19 = arith.addf %16, %18 : vector<16x128xf32>
    %c0_17 = arith.constant 0 : index
    %c0_18 = arith.constant 0 : index
    %20 = vector.load %arg8[%c0_17, %c0_18] : memref<16x128xf32, #tpu.memory_space<vmem>>, vector<16x128xf32>
    tpu.vector_store %arg8[%c0_17, %c0_18], %19 {strides = array<i32>} : memref<16x128xf32, #tpu.memory_space<vmem>>, vector<16x128xf32>,
    return
  }
  func.func @transform_0(%arg0: i32) -> (i32, i32) {
    %c0_i32 = arith.constant 0 : i32
    %c0_i32_0 = arith.constant 0 : i32
    return %arg0, %c0_i32 : i32, i32
  }
  func.func @transform_1(%arg0: i32) -> (i32, i32) {
    %c0_i32 = arith.constant 0 : i32
    %c0_i32_0 = arith.constant 0 : i32
    %c0_i32_1 = arith.constant 0 : i32
    return %c0_i32, %c0_i32_0 : i32, i32
  }
  func.func @transform_2(%arg0: i32) -> (i32, i32) {
    %c0_i32 = arith.constant 0 : i32
    %c0_i32_0 = arith.constant 0 : i32
    %c0_i32_1 = arith.constant 0 : i32
    return %c0_i32, %c0_i32_0 : i32, i32
  }
  func.func @transform_3(%arg0: i32) -> (i32, i32) {
    %c0_i32 = arith.constant 0 : i32
    %c0_i32_0 = arith.constant 0 : i32
    %c0_i32_1 = arith.constant 0 : i32
    return %c0_i32, %c0_i32_0 : i32, i32
  }
  func.func @transform_4(%arg0: i32) -> (i32, i32) {
    %c0_i32 = arith.constant 0 : i32
    %c0_i32_0 = arith.constant 0 : i32
    %c0_i32_1 = arith.constant 0 : i32
    return %c0_i32, %c0_i32_0 : i32, i32
  }
  func.func @transform_5(%arg0: i32) -> (i32, i32) {
    %c0_i32 = arith.constant 0 : i32
    %c0_i32_0 = arith.constant 0 : i32
    %c0_i32_1 = arith.constant 0 : i32
    return %c0_i32, %c0_i32_0 : i32, i32
  }
  func.func @transform_6(%arg0: i32) -> (i32, i32) {
    %c0_i32 = arith.constant 0 : i32
    %c0_i32_0 = arith.constant 0 : i32
    %c0_i32_1 = arith.constant 0 : i32
    return %c0_i32, %c0_i32_0 : i32, i32
  }
  func.func @transform_7(%arg0: i32) -> (i32, i32) {
    %c0_i32 = arith.constant 0 : i32
    %c0_i32_0 = arith.constant 0 : i32
    return %arg0, %c0_i32 : i32, i32
  }
}

module attributes {stable_mosaic.version = 11 : i64} {
  func.func @_linear_kernel(%arg0: i32, %arg1: i32, %arg2: i32, %arg3: memref<16x128xf32, #tpu.memory_space<vmem>>, %arg4: memref<128x128xf32, #tpu.memory_space<vmem>>, %arg5: memref<1x128xf32, #tpu.memory_space<vmem>>, %arg6: memref<16x128xf32, #tpu.memory_space<vmem>>, %arg7: memref<16x128xf32, #tpu.memory_space<vmem>>) attributes {dimension_semantics = [#tpu.dimension_semantics<parallel>, #tpu.dimension_semantics<parallel>, #tpu.dimension_semantics<arbitrary>], iteration_bounds = array<i64: 1, 1, 1>, scalar_prefetch = 0 : i64, scratch_operands = 1 : i64, tpu.core_type = #tpu.core_type<tc>, window_params = [{transform_indices = @transform_0, window_bounds = array<i64: 16, 128>}, {transform_indices = @transform_1, window_bounds = array<i64: 128, 128>}, {transform_indices = @transform_2, window_bounds = array<i64: 1, 128>}, {transform_indices = @transform_3, window_bounds = array<i64: 16, 128>}]} {
    %c0_i32 = arith.constant 0 : i32
    %0 = arith.cmpi eq, %arg2, %c0_i32 : i32
    %1 = arith.extui %0 : i1 to i32
    %c0_i32_0 = arith.constant 0 : i32
    %2 = arith.cmpi ne, %1, %c0_i32_0 : i32
    scf.if %2 {
      %cst_10 = arith.constant 0.000000e+00 : f32
      %12 = vector.broadcast %cst_10 : f32 to vector<16x128xf32>
      %c0_11 = arith.constant 0 : index
      %c0_12 = arith.constant 0 : index
      %13 = vector.load %arg7[%c0_11, %c0_12] : memref<16x128xf32, #tpu.memory_space<vmem>>, vector<16x128xf32>
      tpu.vector_store %arg7[%c0_11, %c0_12], %12 {strides = array<i32>} : memref<16x128xf32, #tpu.memory_space<vmem>>, vector<16x128xf32>,
    } else {
    }
    %c0 = arith.constant 0 : index
    %c0_1 = arith.constant 0 : index
    %3 = vector.load %arg7[%c0, %c0_1] : memref<16x128xf32, #tpu.memory_space<vmem>>, vector<16x128xf32>
    %c0_2 = arith.constant 0 : index
    %c0_3 = arith.constant 0 : index
    %4 = vector.load %arg3[%c0_2, %c0_3] : memref<16x128xf32, #tpu.memory_space<vmem>>, vector<16x128xf32>
    %c0_4 = arith.constant 0 : index
    %c0_5 = arith.constant 0 : index
    %5 = vector.load %arg4[%c0_4, %c0_5] : memref<128x128xf32, #tpu.memory_space<vmem>>, vector<128x128xf32>
    %cst = arith.constant dense<0.000000e+00> : vector<16x128xf32>
    %6 = tpu.matmul %4, %5, %cst {dimension_numbers = #tpu.dot_dimension_numbers<[1], [0], [0], [1], [0, 0, 1, 1], [], []>} : vector<16x128xf32>, vector<128x128xf32>, vector<16x128xf32> -> vector<16x128xf32>
    %7 = arith.addf %3, %6 : vector<16x128xf32>
    %c0_6 = arith.constant 0 : index
    %c0_7 = arith.constant 0 : index
    %8 = vector.load %arg7[%c0_6, %c0_7] : memref<16x128xf32, #tpu.memory_space<vmem>>, vector<16x128xf32>
    tpu.vector_store %arg7[%c0_6, %c0_7], %7 {strides = array<i32>} : memref<16x128xf32, #tpu.memory_space<vmem>>, vector<16x128xf32>,
    %c0_i32_8 = arith.constant 0 : i32
    %9 = arith.cmpi eq, %arg2, %c0_i32_8 : i32
    %10 = arith.extui %9 : i1 to i32
    %c0_i32_9 = arith.constant 0 : i32
    %11 = arith.cmpi ne, %10, %c0_i32_9 : i32
    scf.if %11 {
      %c0_10 = arith.constant 0 : index
      %c0_11 = arith.constant 0 : index
      %12 = vector.load %arg7[%c0_10, %c0_11] : memref<16x128xf32, #tpu.memory_space<vmem>>, vector<16x128xf32>
      %c0_12 = arith.constant 0 : index
      %c0_13 = arith.constant 0 : index
      %13 = vector.load %arg5[%c0_12, %c0_13] : memref<1x128xf32, #tpu.memory_space<vmem>>, vector<1x128xf32>
      %14 = vector.broadcast %13 : vector<1x128xf32> to vector<16x128xf32>
      %15 = arith.addf %12, %14 : vector<16x128xf32>
      %cst_14 = arith.constant 0.000000e+00 : f32
      %16 = vector.broadcast %cst_14 : f32 to vector<16x128xf32>
      %17 = arith.maximumf %15, %16 : vector<16x128xf32>
      %c0_15 = arith.constant 0 : index
      %c0_16 = arith.constant 0 : index
      %18 = vector.load %arg6[%c0_15, %c0_16] : memref<16x128xf32, #tpu.memory_space<vmem>>, vector<16x128xf32>
      tpu.vector_store %arg6[%c0_15, %c0_16], %17 {strides = array<i32>} : memref<16x128xf32, #tpu.memory_space<vmem>>, vector<16x128xf32>,
    } else {
    }
    return
  }
  func.func @transform_0(%arg0: i32, %arg1: i32, %arg2: i32) -> (i32, i32) {
    %c0_i32 = arith.constant 0 : i32
    return %arg0, %arg2 : i32, i32
  }
  func.func @transform_1(%arg0: i32, %arg1: i32, %arg2: i32) -> (i32, i32) {
    %c0_i32 = arith.constant 0 : i32
    return %arg2, %arg1 : i32, i32
  }
  func.func @transform_2(%arg0: i32, %arg1: i32, %arg2: i32) -> (i32, i32) {
    %c0_i32 = arith.constant 0 : i32
    %c0_i32_0 = arith.constant 0 : i32
    return %c0_i32, %arg1 : i32, i32
  }
  func.func @transform_3(%arg0: i32, %arg1: i32, %arg2: i32) -> (i32, i32) {
    %c0_i32 = arith.constant 0 : i32
    return %arg0, %arg1 : i32, i32
  }
}

</mosaic_0001>

<bundles_post_ra>
// kernel: tpu_custom_call.1
= control target key start
LH: loop header
LB: loop body
LE: loop exit
PB: predicated region body
PF: predicated region fallthrough
CT: control target
= control target key end

     0   :  { %12 = vsyncpa [#allocation3], 0  ;;  %s766_s0 = inlined_call_operand.hbm [shape: f32[16,128], index: 0, kind: input, shape index: {}]   ;;  %s767_s1 = inlined_call_operand.hbm [shape: f32[128,128], index: 1, kind: input, shape index: {}]   ;;  %s768_s2 = inlined_call_operand.vmem [shape: f32[1,128], index: 2, kind: input, shape index: {}]   ;;  %s769_s3 = inlined_call_operand.hbm [shape: f32[128,128], index: 3, kind: input, shape index: {}]   ;;  %s770_s4 = inlined_call_operand.vmem [shape: f32[1,128], index: 4, kind: input, shape index: {}]   ;;  %s771_s5 = inlined_call_operand.hbm [shape: f32[128,128], index: 5, kind: input, shape index: {}]   ;;  %s772_s6 = inlined_call_operand.vmem [shape: f32[1,128], index: 6, kind: input, shape index: {}]   ;;  %s773_s7 = inlined_call_operand.hbm [shape: f32[16,128], index: 7, kind: output, shape index: {}]  }
   0x1   :  { %13 = vsyncpa [#allocation6], 0 }
   0x2   :  { %14 = vsyncpa [#allocation9], 0 }
   0x3   :  { %15 = vsyncpa [#allocation4], 0  ;;  %s680_s24 = smov [#allocation5]   ;;  %s681_s26 = smov [#allocation2]  }
   0x4   :  { %s33_s25 = sshll.u32 %s680_s24, 4  ;;  %s21_s27 = sshll.u32 %s681_s26, 4  ;;  %s34_s25 = int_to_ptr.vmem [resolvable:$true] %s33_s25  ;;  %s22_s27 = int_to_ptr.vmem [resolvable:$true] %s21_s27 }
   0x5   :  { %s580_s28 = scalar_lea.vmem %s34_s25, 2048  ;;  %p585_p1 = scmp.lt.s32.totalorder %s34_s25, %s34_s25 }
   0x6   :  { %p581_p0 = scmp.ne.s32.totalorder %s34_s25, %s580_s28  ;;  %p586_p2 = scmp.lt.s32.totalorder %s580_s28, %s580_s28 }
   0x8   :  { %p587_p3 = por %p586_p2, %p585_p1 }
   0xa   :  { %p588_p4 = pnand %p587_p3, %p581_p0 }
   0xc   :  { %591 = shalt.err (!%p588_p4)
}
   0xd   :  { %s682_s29 = smov 128   ;;  %s683_s30 = smov 8  }
   0xe   :  { %39 = dma.hbm_to_vmem [thread:$0]  %s767_s1, 2048, %s34_s25, [#allocation6], %s682_s29, %s682_s29, %s683_s30  }
   0xf   :  { %s600_s10 = scalar_lea.vmem %s22_s27, 256  ;;  %p605_p6 = scmp.lt.s32.totalorder %s22_s27, %s22_s27 }
  0x10   :  { %p601_p5 = scmp.ne.s32.totalorder %s22_s27, %s600_s10  ;;  %p606_p7 = scmp.lt.s32.totalorder %s600_s10, %s600_s10 }
  0x12   :  { %p607_p8 = por %p606_p7, %p605_p6 }
  0x14   :  { %p608_p9 = pnand %p607_p8, %p601_p5 }
  0x16   :  { %611 = shalt.err (!%p608_p9)
}
  0x17   :  { %27 = dma.hbm_to_vmem [thread:$0]  %s766_s0, 256, %s22_s27, [#allocation3], %s682_s29, %s682_s29, %s683_s30  }
  0x18   :  { %s684_s13 = smov [#allocation7]   ;;  %s685_s15 = smov [#allocation8]  }
  0x19   :  { %s47_s14 = sshll.u32 %s684_s13, 4  ;;  %s61_s16 = sshll.u32 %s685_s15, 4  ;;  %s48_s14 = int_to_ptr.vmem [resolvable:$true] %s47_s14  ;;  %s62_s16 = int_to_ptr.vmem [resolvable:$true] %s61_s16 }
  0x1a   :  { %s620_s1 = scalar_lea.vmem %s48_s14, 2048  ;;  %p625_p11 = scmp.lt.s32.totalorder %s48_s14, %s48_s14 }
  0x1b   :  { %p621_p10 = scmp.ne.s32.totalorder %s48_s14, %s620_s1  ;;  %p626_p12 = scmp.lt.s32.totalorder %s620_s1, %s620_s1 }
  0x1d   :  { %p627_p13 = por %p626_p12, %p625_p11 }
  0x1f   :  { %p628_p0 = pnand %p627_p13, %p621_p10 }
  0x21   :  { %631 = shalt.err (!%p628_p0)
}
  0x22   :  { %53 = dma.hbm_to_vmem [thread:$0]  %s769_s3, 2048, %s48_s14, [#allocation6], %s682_s29, %s682_s29, %s683_s30  }
  0x23   :  { %s640_s0 = scalar_lea.vmem %s62_s16, 2048  ;;  %p645_p2 = scmp.lt.s32.totalorder %s62_s16, %s62_s16 }
  0x24   :  { %p641_p1 = scmp.ne.s32.totalorder %s62_s16, %s640_s0  ;;  %p646_p3 = scmp.lt.s32.totalorder %s640_s0, %s640_s0 }
  0x26   :  { %p647_p4 = por %p646_p3, %p645_p2 }
  0x28   :  { %p648_p5 = pnand %p647_p4, %p641_p1 }
  0x2a   :  { %651 = shalt.err (!%p648_p5)
}
  0x2b   :  { %67 = dma.hbm_to_vmem [thread:$0]  %s771_s5, 2048, %s62_s16, [#allocation9], %s682_s29, %s682_s29, %s683_s30  }
  0x2c   :  { %672 = dma.done.wait [#allocation3], 256  }
  0x2d   :  { %673 = vsyncadd [#allocation3], 4294967040 }
  0x2e   :  { %674 = dma.done.wait [#allocation6], 4096  }
  0x2f   :  { %675 = vsyncadd [#allocation6], 4294963200 }
  0x30   :  { %676 = dma.done.wait [#allocation9], 2048  }
  0x31   :  { %677 = vsyncadd [#allocation9], 4294965248  ;;  %v99_v0 = vld [vmem:[#allocation5 + $0x78] sm:$0xff]  ;;  %v98_v1 = vld [vmem:[#allocation5 + $0x70] sm:$0xff]  ;;  %s686_s24 = smov [#allocation10]  }
  0x32   :  { %460 = vmatprep.subr.mxu0 %v99_v0  ;;  %v97_v2 = vld [vmem:[#allocation5 + $0x68] sm:$0xff]  ;;  %v96_v3 = vld [vmem:[#allocation5 + $0x60] sm:$0xff]  ;;  %v82_v4 = vld [vmem:[#allocation2] sm:$0xff]  ;;  %s389_s25 = sshll.u32 %s686_s24, 4  ;;  %s390_s25 = int_to_ptr.vmem [resolvable:$true] %s389_s25 }
  0x33   :  { %461 = vmatpush3.msra.mxu0 %v99_v0  ;;  %v95_v5 = vld [vmem:[#allocation5 + $0x58] sm:$0xff]  ;;  %492 = vmatprep.mubr.f32.mxu0 %v82_v4  ;;  %v198_v7 = vld [vmem:[#allocation7 + $0x70] sm:$0xff]  ;;  %v197_v9 = vld [vmem:[#allocation7 + $0x68] sm:$0xff]  ;;  %p657_p7 = scmp.lt.s32.totalorder %s390_s25, %s390_s25 }
  0x34   :  { %462 = vmatprep.subr.mxu0 %v98_v1  ;;  %v199_v6 = vld [vmem:[#allocation7 + $0x78] sm:$0xff]  ;;  %v94_v8 = vld [vmem:[#allocation5 + $0x50] sm:$0xff]  ;;  %v93_v10 = vld [vmem:[#allocation5 + $0x48] sm:$0xff] }
  0x35   :  { %463 = vmatpush3.msra.mxu0 %v98_v1  ;;  %495 = vmatprep.subr.mxu1 %v199_v6  ;;  %v196_v11 = vld [vmem:[#allocation7 + $0x60] sm:$0xff]  ;;  %v195_v13 = vld [vmem:[#allocation7 + $0x58] sm:$0xff]  ;;  %v194_v15 = vld [vmem:[#allocation7 + $0x50] sm:$0xff] }
  0x36   :  { %464 = vmatprep.subr.mxu0 %v97_v2  ;;  %496 = vmatpush3.msra.mxu1 %v199_v6  ;;  %v92_v12 = vld [vmem:[#allocation5 + $0x40] sm:$0xff]  ;;  %v91_v14 = vld [vmem:[#allocation5 + $0x38] sm:$0xff]  ;;  %v90_v16 = vld [vmem:[#allocation5 + $0x30] sm:$0xff] }
  0x37   :  { %465 = vmatpush3.msra.mxu0 %v97_v2  ;;  %497 = vmatprep.subr.mxu1 %v198_v7  ;;  %v193_v17 = vld [vmem:[#allocation7 + $0x48] sm:$0xff]  ;;  %v192_v19 = vld [vmem:[#allocation7 + $0x40] sm:$0xff]  ;;  %v191_v21 = vld [vmem:[#allocation7 + $0x38] sm:$0xff] }
  0x38   :  { %466 = vmatprep.subr.mxu0 %v96_v3  ;;  %498 = vmatpush3.msra.mxu1 %v198_v7  ;;  %v89_v18 = vld [vmem:[#allocation5 + $0x28] sm:$0xff]  ;;  %v88_v20 = vld [vmem:[#allocation5 + $0x20] sm:$0xff]  ;;  %v87_v22 = vld [vmem:[#allocation5 + $0x18] sm:$0xff] }
  0x39   :  { %467 = vmatpush3.msra.mxu0 %v96_v3  ;;  %499 = vmatprep.subr.mxu1 %v197_v9  ;;  %v190_v23 = vld [vmem:[#allocation7 + $0x30] sm:$0xff]  ;;  %v189_v25 = vld [vmem:[#allocation7 + $0x28] sm:$0xff]  ;;  %v188_v27 = vld [vmem:[#allocation7 + $0x20] sm:$0xff] }
  0x3a   :  { %468 = vmatprep.subr.mxu0 %v95_v5  ;;  %500 = vmatpush3.msra.mxu1 %v197_v9  ;;  %v86_v24 = vld [vmem:[#allocation5 + $0x10] sm:$0xff]  ;;  %v85_v26 = vld [vmem:[#allocation5 + $0x8] sm:$0xff]  ;;  %v84_v28 = vld [vmem:[#allocation5] sm:$0xff] }
  0x3b   :  { %469 = vmatpush3.msra.mxu0 %v95_v5  ;;  %501 = vmatprep.subr.mxu1 %v196_v11  ;;  %v83_v29 = vld [vmem:[#allocation2 + $0x8] sm:$0xff]  ;;  %v186_v31 = vld [vmem:[#allocation7 + $0x10] sm:$0xff]  ;;  %v185_v32 = vld [vmem:[#allocation7 + $0x8] sm:$0xff] }
  0x3c   :  { %470 = vmatprep.subr.mxu0 %v94_v8  ;;  %502 = vmatpush3.msra.mxu1 %v196_v11  ;;  %v187_v30 = vld [vmem:[#allocation7 + $0x18] sm:$0xff]  ;;  %v184_v33 = vld [vmem:[#allocation7] sm:$0xff]  ;;  %v298_v35 = vld [vmem:[#allocation8 + $0x70] sm:$0xff] }
  0x3d   :  { %471 = vmatpush3.msra.mxu0 %v94_v8  ;;  %503 = vmatprep.subr.mxu1 %v195_v13  ;;  %v299_v34 = vld [vmem:[#allocation8 + $0x78] sm:$0xff]  ;;  %v297_v36 = vld [vmem:[#allocation8 + $0x68] sm:$0xff]  ;;  %v296_v37 = vld [vmem:[#allocation8 + $0x60] sm:$0xff] }
  0x3e   :  { %472 = vmatprep.subr.mxu0 %v93_v10  ;;  %504 = vmatpush3.msra.mxu1 %v195_v13  ;;  %v295_v38 = vld [vmem:[#allocation8 + $0x58] sm:$0xff]  ;;  %v294_v39 = vld [vmem:[#allocation8 + $0x50] sm:$0xff]  ;;  %v293_v40 = vld [vmem:[#allocation8 + $0x48] sm:$0xff] }
  0x3f   :  { %473 = vmatpush3.msra.mxu0 %v93_v10  ;;  %505 = vmatprep.subr.mxu1 %v194_v15  ;;  %v292_v41 = vld [vmem:[#allocation8 + $0x40] sm:$0xff]  ;;  %v291_v42 = vld [vmem:[#allocation8 + $0x38] sm:$0xff]  ;;  %v290_v43 = vld [vmem:[#allocation8 + $0x30] sm:$0xff] }
  0x40   :  { %474 = vmatprep.subr.mxu0 %v92_v12  ;;  %506 = vmatpush3.msra.mxu1 %v194_v15  ;;  %v289_v44 = vld [vmem:[#allocation8 + $0x28] sm:$0xff]  ;;  %v288_v45 = vld [vmem:[#allocation8 + $0x20] sm:$0xff]  ;;  %v403_v46 = vld [vmem:[%s768_s2] ss:$0 sm:$0xff] }
  0x41   :  { %475 = vmatpush3.msra.mxu0 %v92_v12  ;;  %507 = vmatprep.subr.mxu1 %v193_v17  ;;  %v287_v53 = vld [vmem:[#allocation8 + $0x18] sm:$0xff]  ;;  %v286_v54 = vld [vmem:[#allocation8 + $0x10] sm:$0xff]  ;;  %v285_v55 = vld [vmem:[#allocation8 + $0x8] sm:$0xff] }
  0x42   :  { %476 = vmatprep.subr.mxu0 %v91_v14  ;;  %508 = vmatpush3.msra.mxu1 %v193_v17  ;;  %v284_v56 = vld [vmem:[#allocation8] sm:$0xff]  ;;  %v404_v57 = vld [vmem:[%s770_s4] ss:$0 sm:$0xff]  ;;  %s652_s4 = scalar_lea.vmem %s390_s25, 256 }
  0x43   :  { %477 = vmatpush3.msra.mxu0 %v91_v14  ;;  %509 = vmatprep.subr.mxu1 %v192_v19  ;;  %v405_v0 = vld [vmem:[%s772_s6] ss:$0 sm:$0xff]  ;;  %p653_p6 = scmp.ne.s32.totalorder %s390_s25, %s652_s4  ;;  %p658_p8 = scmp.lt.s32.totalorder %s652_s4, %s652_s4 }
  0x44   :  { %478 = vmatprep.subr.mxu0 %v90_v16  ;;  %510 = vmatpush3.msra.mxu1 %v192_v19 }
  0x45   :  { %479 = vmatpush3.msra.mxu0 %v90_v16  ;;  %511 = vmatprep.subr.mxu1 %v191_v21  ;;  %p659_p9 = por %p658_p8, %p657_p7 }
  0x46   :  { %480 = vmatprep.subr.mxu0 %v89_v18  ;;  %512 = vmatpush3.msra.mxu1 %v191_v21 }
  0x47   :  { %481 = vmatpush3.msra.mxu0 %v89_v18  ;;  %513 = vmatprep.subr.mxu1 %v190_v23  ;;  %p660_p10 = pnand %p659_p9, %p653_p6 }
  0x48   :  { %482 = vmatprep.subr.mxu0 %v88_v20  ;;  %514 = vmatpush3.msra.mxu1 %v190_v23 }
  0x49   :  { %483 = vmatpush3.msra.mxu0 %v88_v20  ;;  %515 = vmatprep.subr.mxu1 %v189_v25 }
  0x4a   :  { %484 = vmatprep.subr.mxu0 %v87_v22  ;;  %516 = vmatpush3.msra.mxu1 %v189_v25 }
  0x4b   :  { %485 = vmatpush3.msra.mxu0 %v87_v22  ;;  %517 = vmatprep.subr.mxu1 %v188_v27 }
  0x4c   :  { %486 = vmatprep.subr.mxu0 %v86_v24  ;;  %518 = vmatpush3.msra.mxu1 %v188_v27 }
  0x4d   :  { %487 = vmatpush3.msra.mxu0 %v86_v24  ;;  %519 = vmatprep.subr.mxu1 %v187_v30 }
  0x4e   :  { %488 = vmatprep.subr.mxu0 %v85_v26  ;;  %520 = vmatpush3.msra.mxu1 %v187_v30 }
  0x4f   :  { %489 = vmatpush3.msra.mxu0 %v85_v26  ;;  %521 = vmatprep.subr.mxu1 %v186_v31 }
  0x50   :  { %490 = vmatprep.subr.mxu0 %v84_v28  ;;  %522 = vmatpush3.msra.mxu1 %v186_v31 }
  0x51   :  { %491 = vmatpush3.msra.mxu0 %v84_v28  ;;  %523 = vmatprep.subr.mxu1 %v185_v32 }
  0x52   :  { %493 = vmatmul.mubr.f32.vlgmr.msra.gmra.mxu0 %v83_v29  ;;  %524 = vmatpush3.msra.mxu1 %v185_v32 }
  0x53   :  { %525 = vmatprep.subr.mxu1 %v184_v33  ;;  %530 = vmatprep.subr.mxu0 %v299_v34 }
  0x54   :  { %526 = vmatpush3.msra.mxu1 %v184_v33  ;;  %531 = vmatpush3.msra.mxu0 %v299_v34 }
  0x55   :  { %532 = vmatprep.subr.mxu0 %v298_v35 }
  0x56   :  { %533 = vmatpush3.msra.mxu0 %v298_v35 }
  0x57   :  { %534 = vmatprep.subr.mxu0 %v297_v36 }
  0x58   :  { %535 = vmatpush3.msra.mxu0 %v297_v36 }
  0x59   :  { %536 = vmatprep.subr.mxu0 %v296_v37 }
  0x5a   :  { %537 = vmatpush3.msra.mxu0 %v296_v37 }
  0x5b   :  { %538 = vmatprep.subr.mxu0 %v295_v38 }
  0x5c   :  { %539 = vmatpush3.msra.mxu0 %v295_v38 }
  0x5d   :  { %540 = vmatprep.subr.mxu0 %v294_v39 }
  0x5e   :  { %541 = vmatpush3.msra.mxu0 %v294_v39 }
  0x5f   :  { %542 = vmatprep.subr.mxu0 %v293_v40 }
  0x60   :  { %543 = vmatpush3.msra.mxu0 %v293_v40 }
  0x61   :  { %544 = vmatprep.subr.mxu0 %v292_v41 }
  0x62   :  { %545 = vmatpush3.msra.mxu0 %v292_v41 }
  0x63   :  { %546 = vmatprep.subr.mxu0 %v291_v42 }
  0x64   :  { %547 = vmatpush3.msra.mxu0 %v291_v42 }
  0x65   :  { %548 = vmatprep.subr.mxu0 %v290_v43 }
  0x66   :  { %549 = vmatpush3.msra.mxu0 %v290_v43 }
  0x67   :  { %550 = vmatprep.subr.mxu0 %v289_v44 }
  0x68   :  { %551 = vmatpush3.msra.mxu0 %v289_v44 }
  0x69   :  { %552 = vmatprep.subr.mxu0 %v288_v45 }
  0x6a   :  { %553 = vmatpush3.msra.mxu0 %v288_v45 }
  0x6b   :  { %554 = vmatprep.subr.mxu0 %v287_v53 }
  0x6c   :  { %555 = vmatpush3.msra.mxu0 %v287_v53 }
  0x6d   :  { %556 = vmatprep.subr.mxu0 %v286_v54 }
  0x6e   :  { %557 = vmatpush3.msra.mxu0 %v286_v54 }
  0x6f   :  { %558 = vmatprep.subr.mxu0 %v285_v55 }
  0x70   :  { %559 = vmatpush3.msra.mxu0 %v285_v55 }
  0x71   :  { %560 = vmatprep.subr.mxu0 %v284_v56 }
  0x72   :  { %561 = vmatpush3.msra.mxu0 %v284_v56 }
 0x112   :  { %v494_v47 = vpop.f32.mrf.mxu0 }
 0x113   :  { %v179_v48 = vadd.f32 %v494_v47, %v403_v46 }
 0x114   :  { %v173_v49 = vpop.f32.mrf.mxu0 }
 0x115   :  { %v174_v50 = vadd.f32 %v403_v46, %v173_v49  ;;  %v183_v52 = vmax.f32 %v179_v48, 0.0 }
 0x117   :  { %v182_v51 = vmax.f32 %v174_v50, 0.0 }
 0x119   :  { %527 = vmatprep.mubr.f32.mxu1 %v182_v51 }
 0x11a   :  { %528 = vmatmul.mubr.f32.vlgmr.msra.gmra.mxu1 %v183_v52 }
 0x1da   :  { %v529_v58 = vpop.f32.mrf.mxu1 }
 0x1db   :  { %v279_v59 = vadd.f32 %v529_v58, %v404_v57 }
 0x1dc   :  { %v273_v60 = vpop.f32.mrf.mxu1 }
 0x1dd   :  { %v274_v61 = vadd.f32 %v404_v57, %v273_v60  ;;  %v283_v63 = vmax.f32 %v279_v59, 0.0 }
 0x1df   :  { %v282_v62 = vmax.f32 %v274_v61, 0.0 }
 0x1e1   :  { %562 = vmatprep.mubr.f32.mxu0 %v282_v62 }
 0x1e2   :  { %563 = vmatmul.mubr.f32.vlgmr.msra.gmra.mxu0 %v283_v63 }
 0x2a2   :  { %v564_v1 = vpop.f32.mrf.mxu0 }
 0x2a3   :  { %v379_v2 = vadd.f32 %v564_v1, %v405_v0 }
 0x2a4   :  { %v373_v3 = vpop.f32.mrf.mxu0 }
 0x2a5   :  { %383 = vst [vmem:[#allocation10 + $0x8] sm:$0xff] %v379_v2  ;;  %v374_v4 = vadd.f32 %v405_v0, %v373_v3 }
 0x2a7   :  { %382 = vst [vmem:[#allocation10] sm:$0xff] %v374_v4 }
 0x2a8   :  { %663 = shalt.err (!%p660_p10)
}
 0x2a9   :  { %395 = dma.vmem_to_hbm [thread:$0]  %s390_s25, 256, %s773_s7, [#allocation4], %s682_s29, %s682_s29, %s683_s30  }
 0x2aa   :  { %678 = dma.done.wait [#allocation4], 256  }
 0x2ab   :  { %679 = vsyncadd [#allocation4], 4294967040 }
 0x2ac   :  { %399 = vsyncpa [#allocation3], 1 }
 0x2ad   :  { %400 = vsyncpa [#allocation6], 1 }
 0x2ae   :  { %401 = vsyncpa [#allocation9], 1 }
 0x2af   :  { %402 = vsyncpa [#allocation4], 1 }

// kernel: tpu_custom_call.1
= control target key start
LH: loop header
LB: loop body
LE: loop exit
PB: predicated region body
PF: predicated region fallthrough
CT: control target
= control target key end

     0   :  { %12 = vsyncpa [#allocation3], 0  ;;  %s766_s0 = inlined_call_operand.hbm [shape: f32[16,128], index: 0, kind: input, shape index: {}]   ;;  %s767_s1 = inlined_call_operand.hbm [shape: f32[128,128], index: 1, kind: input, shape index: {}]   ;;  %s768_s2 = inlined_call_operand.vmem [shape: f32[1,128], index: 2, kind: input, shape index: {}]   ;;  %s769_s3 = inlined_call_operand.hbm [shape: f32[128,128], index: 3, kind: input, shape index: {}]   ;;  %s770_s4 = inlined_call_operand.vmem [shape: f32[1,128], index: 4, kind: input, shape index: {}]   ;;  %s771_s5 = inlined_call_operand.hbm [shape: f32[128,128], index: 5, kind: input, shape index: {}]   ;;  %s772_s6 = inlined_call_operand.vmem [shape: f32[1,128], index: 6, kind: input, shape index: {}]   ;;  %s773_s7 = inlined_call_operand.hbm [shape: f32[16,128], index: 7, kind: output, shape index: {}]  }
   0x1   :  { %13 = vsyncpa [#allocation6], 0 }
   0x2   :  { %14 = vsyncpa [#allocation9], 0 }
   0x3   :  { %15 = vsyncpa [#allocation4], 0  ;;  %s680_s24 = smov [#allocation5]   ;;  %s681_s26 = smov [#allocation2]  }
   0x4   :  { %s33_s25 = sshll.u32 %s680_s24, 4  ;;  %s21_s27 = sshll.u32 %s681_s26, 4  ;;  %s34_s25 = int_to_ptr.vmem [resolvable:$true] %s33_s25  ;;  %s22_s27 = int_to_ptr.vmem [resolvable:$true] %s21_s27 }
   0x5   :  { %s580_s28 = scalar_lea.vmem %s34_s25, 2048  ;;  %p585_p1 = scmp.lt.s32.totalorder %s34_s25, %s34_s25 }
   0x6   :  { %p581_p0 = scmp.ne.s32.totalorder %s34_s25, %s580_s28  ;;  %p586_p2 = scmp.lt.s32.totalorder %s580_s28, %s580_s28 }
   0x8   :  { %p587_p3 = por %p586_p2, %p585_p1 }
   0xa   :  { %p588_p4 = pnand %p587_p3, %p581_p0 }
   0xc   :  { %591 = shalt.err (!%p588_p4)
}
   0xd   :  { %s682_s29 = smov 128   ;;  %s683_s30 = smov 8  }
   0xe   :  { %39 = dma.hbm_to_vmem [thread:$0]  %s767_s1, 2048, %s34_s25, [#allocation6], %s682_s29, %s682_s29, %s683_s30  }
   0xf   :  { %s600_s10 = scalar_lea.vmem %s22_s27, 256  ;;  %p605_p6 = scmp.lt.s32.totalorder %s22_s27, %s22_s27 }
  0x10   :  { %p601_p5 = scmp.ne.s32.totalorder %s22_s27, %s600_s10  ;;  %p606_p7 = scmp.lt.s32.totalorder %s600_s10, %s600_s10 }
  0x12   :  { %p607_p8 = por %p606_p7, %p605_p6 }
  0x14   :  { %p608_p9 = pnand %p607_p8, %p601_p5 }
  0x16   :  { %611 = shalt.err (!%p608_p9)
}
  0x17   :  { %27 = dma.hbm_to_vmem [thread:$0]  %s766_s0, 256, %s22_s27, [#allocation3], %s682_s29, %s682_s29, %s683_s30  }
  0x18   :  { %s684_s13 = smov [#allocation7]   ;;  %s685_s15 = smov [#allocation8]  }
  0x19   :  { %s47_s14 = sshll.u32 %s684_s13, 4  ;;  %s61_s16 = sshll.u32 %s685_s15, 4  ;;  %s48_s14 = int_to_ptr.vmem [resolvable:$true] %s47_s14  ;;  %s62_s16 = int_to_ptr.vmem [resolvable:$true] %s61_s16 }
  0x1a   :  { %s620_s1 = scalar_lea.vmem %s48_s14, 2048  ;;  %p625_p11 = scmp.lt.s32.totalorder %s48_s14, %s48_s14 }
  0x1b   :  { %p621_p10 = scmp.ne.s32.totalorder %s48_s14, %s620_s1  ;;  %p626_p12 = scmp.lt.s32.totalorder %s620_s1, %s620_s1 }
  0x1d   :  { %p627_p13 = por %p626_p12, %p625_p11 }
  0x1f   :  { %p628_p0 = pnand %p627_p13, %p621_p10 }
  0x21   :  { %631 = shalt.err (!%p628_p0)
}
  0x22   :  { %53 = dma.hbm_to_vmem [thread:$0]  %s769_s3, 2048, %s48_s14, [#allocation6], %s682_s29, %s682_s29, %s683_s30  }
  0x23   :  { %s640_s0 = scalar_lea.vmem %s62_s16, 2048  ;;  %p645_p2 = scmp.lt.s32.totalorder %s62_s16, %s62_s16 }
  0x24   :  { %p641_p1 = scmp.ne.s32.totalorder %s62_s16, %s640_s0  ;;  %p646_p3 = scmp.lt.s32.totalorder %s640_s0, %s640_s0 }
  0x26   :  { %p647_p4 = por %p646_p3, %p645_p2 }
  0x28   :  { %p648_p5 = pnand %p647_p4, %p641_p1 }
  0x2a   :  { %651 = shalt.err (!%p648_p5)
}
  0x2b   :  { %67 = dma.hbm_to_vmem [thread:$0]  %s771_s5, 2048, %s62_s16, [#allocation9], %s682_s29, %s682_s29, %s683_s30  }
  0x2c   :  { %672 = dma.done.wait [#allocation3], 256  }
  0x2d   :  { %673 = vsyncadd [#allocation3], 4294967040 }
  0x2e   :  { %674 = dma.done.wait [#allocation6], 4096  }
  0x2f   :  { %675 = vsyncadd [#allocation6], 4294963200 }
  0x30   :  { %676 = dma.done.wait [#allocation9], 2048  }
  0x31   :  { %677 = vsyncadd [#allocation9], 4294965248  ;;  %v99_v0 = vld [vmem:[#allocation5 + $0x78] sm:$0xff]  ;;  %v98_v1 = vld [vmem:[#allocation5 + $0x70] sm:$0xff]  ;;  %s686_s24 = smov [#allocation10]  }
  0x32   :  { %460 = vmatprep.subr.mxu0 %v99_v0  ;;  %v97_v2 = vld [vmem:[#allocation5 + $0x68] sm:$0xff]  ;;  %v96_v3 = vld [vmem:[#allocation5 + $0x60] sm:$0xff]  ;;  %v82_v4 = vld [vmem:[#allocation2] sm:$0xff]  ;;  %s389_s25 = sshll.u32 %s686_s24, 4  ;;  %s390_s25 = int_to_ptr.vmem [resolvable:$true] %s389_s25 }
  0x33   :  { %461 = vmatpush3.msra.mxu0 %v99_v0  ;;  %v95_v5 = vld [vmem:[#allocation5 + $0x58] sm:$0xff]  ;;  %492 = vmatprep.mubr.f32.mxu0 %v82_v4  ;;  %v198_v7 = vld [vmem:[#allocation7 + $0x70] sm:$0xff]  ;;  %v197_v9 = vld [vmem:[#allocation7 + $0x68] sm:$0xff]  ;;  %p657_p7 = scmp.lt.s32.totalorder %s390_s25, %s390_s25 }
  0x34   :  { %462 = vmatprep.subr.mxu0 %v98_v1  ;;  %v199_v6 = vld [vmem:[#allocation7 + $0x78] sm:$0xff]  ;;  %v94_v8 = vld [vmem:[#allocation5 + $0x50] sm:$0xff]  ;;  %v93_v10 = vld [vmem:[#allocation5 + $0x48] sm:$0xff] }
  0x35   :  { %463 = vmatpush3.msra.mxu0 %v98_v1  ;;  %495 = vmatprep.subr.mxu1 %v199_v6  ;;  %v196_v11 = vld [vmem:[#allocation7 + $0x60] sm:$0xff]  ;;  %v195_v13 = vld [vmem:[#allocation7 + $0x58] sm:$0xff]  ;;  %v194_v15 = vld [vmem:[#allocation7 + $0x50] sm:$0xff] }
  0x36   :  { %464 = vmatprep.subr.mxu0 %v97_v2  ;;  %496 = vmatpush3.msra.mxu1 %v199_v6  ;;  %v92_v12 = vld [vmem:[#allocation5 + $0x40] sm:$0xff]  ;;  %v91_v14 = vld [vmem:[#allocation5 + $0x38] sm:$0xff]  ;;  %v90_v16 = vld [vmem:[#allocation5 + $0x30] sm:$0xff] }
  0x37   :  { %465 = vmatpush3.msra.mxu0 %v97_v2  ;;  %497 = vmatprep.subr.mxu1 %v198_v7  ;;  %v193_v17 = vld [vmem:[#allocation7 + $0x48] sm:$0xff]  ;;  %v192_v19 = vld [vmem:[#allocation7 + $0x40] sm:$0xff]  ;;  %v191_v21 = vld [vmem:[#allocation7 + $0x38] sm:$0xff] }
  0x38   :  { %466 = vmatprep.subr.mxu0 %v96_v3  ;;  %498 = vmatpush3.msra.mxu1 %v198_v7  ;;  %v89_v18 = vld [vmem:[#allocation5 + $0x28] sm:$0xff]  ;;  %v88_v20 = vld [vmem:[#allocation5 + $0x20] sm:$0xff]  ;;  %v87_v22 = vld [vmem:[#allocation5 + $0x18] sm:$0xff] }
  0x39   :  { %467 = vmatpush3.msra.mxu0 %v96_v3  ;;  %499 = vmatprep.subr.mxu1 %v197_v9  ;;  %v190_v23 = vld [vmem:[#allocation7 + $0x30] sm:$0xff]  ;;  %v189_v25 = vld [vmem:[#allocation7 + $0x28] sm:$0xff]  ;;  %v188_v27 = vld [vmem:[#allocation7 + $0x20] sm:$0xff] }
  0x3a   :  { %468 = vmatprep.subr.mxu0 %v95_v5  ;;  %500 = vmatpush3.msra.mxu1 %v197_v9  ;;  %v86_v24 = vld [vmem:[#allocation5 + $0x10] sm:$0xff]  ;;  %v85_v26 = vld [vmem:[#allocation5 + $0x8] sm:$0xff]  ;;  %v84_v28 = vld [vmem:[#allocation5] sm:$0xff] }
  0x3b   :  { %469 = vmatpush3.msra.mxu0 %v95_v5  ;;  %501 = vmatprep.subr.mxu1 %v196_v11  ;;  %v83_v29 = vld [vmem:[#allocation2 + $0x8] sm:$0xff]  ;;  %v186_v31 = vld [vmem:[#allocation7 + $0x10] sm:$0xff]  ;;  %v185_v32 = vld [vmem:[#allocation7 + $0x8] sm:$0xff] }
  0x3c   :  { %470 = vmatprep.subr.mxu0 %v94_v8  ;;  %502 = vmatpush3.msra.mxu1 %v196_v11  ;;  %v187_v30 = vld [vmem:[#allocation7 + $0x18] sm:$0xff]  ;;  %v184_v33 = vld [vmem:[#allocation7] sm:$0xff]  ;;  %v298_v35 = vld [vmem:[#allocation8 + $0x70] sm:$0xff] }
  0x3d   :  { %471 = vmatpush3.msra.mxu0 %v94_v8  ;;  %503 = vmatprep.subr.mxu1 %v195_v13  ;;  %v299_v34 = vld [vmem:[#allocation8 + $0x78] sm:$0xff]  ;;  %v297_v36 = vld [vmem:[#allocation8 + $0x68] sm:$0xff]  ;;  %v296_v37 = vld [vmem:[#allocation8 + $0x60] sm:$0xff] }
  0x3e   :  { %472 = vmatprep.subr.mxu0 %v93_v10  ;;  %504 = vmatpush3.msra.mxu1 %v195_v13  ;;  %v295_v38 = vld [vmem:[#allocation8 + $0x58] sm:$0xff]  ;;  %v294_v39 = vld [vmem:[#allocation8 + $0x50] sm:$0xff]  ;;  %v293_v40 = vld [vmem:[#allocation8 + $0x48] sm:$0xff] }
  0x3f   :  { %473 = vmatpush3.msra.mxu0 %v93_v10  ;;  %505 = vmatprep.subr.mxu1 %v194_v15  ;;  %v292_v41 = vld [vmem:[#allocation8 + $0x40] sm:$0xff]  ;;  %v291_v42 = vld [vmem:[#allocation8 + $0x38] sm:$0xff]  ;;  %v290_v43 = vld [vmem:[#allocation8 + $0x30] sm:$0xff] }
  0x40   :  { %474 = vmatprep.subr.mxu0 %v92_v12  ;;  %506 = vmatpush3.msra.mxu1 %v194_v15  ;;  %v289_v44 = vld [vmem:[#allocation8 + $0x28] sm:$0xff]  ;;  %v288_v45 = vld [vmem:[#allocation8 + $0x20] sm:$0xff]  ;;  %v403_v46 = vld [vmem:[%s768_s2] ss:$0 sm:$0xff] }
  0x41   :  { %475 = vmatpush3.msra.mxu0 %v92_v12  ;;  %507 = vmatprep.subr.mxu1 %v193_v17  ;;  %v287_v53 = vld [vmem:[#allocation8 + $0x18] sm:$0xff]  ;;  %v286_v54 = vld [vmem:[#allocation8 + $0x10] sm:$0xff]  ;;  %v285_v55 = vld [vmem:[#allocation8 + $0x8] sm:$0xff] }
  0x42   :  { %476 = vmatprep.subr.mxu0 %v91_v14  ;;  %508 = vmatpush3.msra.mxu1 %v193_v17  ;;  %v284_v56 = vld [vmem:[#allocation8] sm:$0xff]  ;;  %v404_v57 = vld [vmem:[%s770_s4] ss:$0 sm:$0xff]  ;;  %s652_s4 = scalar_lea.vmem %s390_s25, 256 }
  0x43   :  { %477 = vmatpush3.msra.mxu0 %v91_v14  ;;  %509 = vmatprep.subr.mxu1 %v192_v19  ;;  %v405_v0 = vld [vmem:[%s772_s6] ss:$0 sm:$0xff]  ;;  %p653_p6 = scmp.ne.s32.totalorder %s390_s25, %s652_s4  ;;  %p658_p8 = scmp.lt.s32.totalorder %s652_s4, %s652_s4 }
  0x44   :  { %478 = vmatprep.subr.mxu0 %v90_v16  ;;  %510 = vmatpush3.msra.mxu1 %v192_v19 }
  0x45   :  { %479 = vmatpush3.msra.mxu0 %v90_v16  ;;  %511 = vmatprep.subr.mxu1 %v191_v21  ;;  %p659_p9 = por %p658_p8, %p657_p7 }
  0x46   :  { %480 = vmatprep.subr.mxu0 %v89_v18  ;;  %512 = vmatpush3.msra.mxu1 %v191_v21 }
  0x47   :  { %481 = vmatpush3.msra.mxu0 %v89_v18  ;;  %513 = vmatprep.subr.mxu1 %v190_v23  ;;  %p660_p10 = pnand %p659_p9, %p653_p6 }
  0x48   :  { %482 = vmatprep.subr.mxu0 %v88_v20  ;;  %514 = vmatpush3.msra.mxu1 %v190_v23 }
  0x49   :  { %483 = vmatpush3.msra.mxu0 %v88_v20  ;;  %515 = vmatprep.subr.mxu1 %v189_v25 }
  0x4a   :  { %484 = vmatprep.subr.mxu0 %v87_v22  ;;  %516 = vmatpush3.msra.mxu1 %v189_v25 }
  0x4b   :  { %485 = vmatpush3.msra.mxu0 %v87_v22  ;;  %517 = vmatprep.subr.mxu1 %v188_v27 }
  0x4c   :  { %486 = vmatprep.subr.mxu0 %v86_v24  ;;  %518 = vmatpush3.msra.mxu1 %v188_v27 }
  0x4d   :  { %487 = vmatpush3.msra.mxu0 %v86_v24  ;;  %519 = vmatprep.subr.mxu1 %v187_v30 }
  0x4e   :  { %488 = vmatprep.subr.mxu0 %v85_v26  ;;  %520 = vmatpush3.msra.mxu1 %v187_v30 }
  0x4f   :  { %489 = vmatpush3.msra.mxu0 %v85_v26  ;;  %521 = vmatprep.subr.mxu1 %v186_v31 }
  0x50   :  { %490 = vmatprep.subr.mxu0 %v84_v28  ;;  %522 = vmatpush3.msra.mxu1 %v186_v31 }
  0x51   :  { %491 = vmatpush3.msra.mxu0 %v84_v28  ;;  %523 = vmatprep.subr.mxu1 %v185_v32 }
  0x52   :  { %493 = vmatmul.mubr.f32.vlgmr.msra.gmra.mxu0 %v83_v29  ;;  %524 = vmatpush3.msra.mxu1 %v185_v32 }
  0x53   :  { %525 = vmatprep.subr.mxu1 %v184_v33  ;;  %530 = vmatprep.subr.mxu0 %v299_v34 }
  0x54   :  { %526 = vmatpush3.msra.mxu1 %v184_v33  ;;  %531 = vmatpush3.msra.mxu0 %v299_v34 }
  0x55   :  { %532 = vmatprep.subr.mxu0 %v298_v35 }
  0x56   :  { %533 = vmatpush3.msra.mxu0 %v298_v35 }
  0x57   :  { %534 = vmatprep.subr.mxu0 %v297_v36 }
  0x58   :  { %535 = vmatpush3.msra.mxu0 %v297_v36 }
  0x59   :  { %536 = vmatprep.subr.mxu0 %v296_v37 }
  0x5a   :  { %537 = vmatpush3.msra.mxu0 %v296_v37 }
  0x5b   :  { %538 = vmatprep.subr.mxu0 %v295_v38 }
  0x5c   :  { %539 = vmatpush3.msra.mxu0 %v295_v38 }
  0x5d   :  { %540 = vmatprep.subr.mxu0 %v294_v39 }
  0x5e   :  { %541 = vmatpush3.msra.mxu0 %v294_v39 }
  0x5f   :  { %542 = vmatprep.subr.mxu0 %v293_v40 }
  0x60   :  { %543 = vmatpush3.msra.mxu0 %v293_v40 }
  0x61   :  { %544 = vmatprep.subr.mxu0 %v292_v41 }
  0x62   :  { %545 = vmatpush3.msra.mxu0 %v292_v41 }
  0x63   :  { %546 = vmatprep.subr.mxu0 %v291_v42 }
  0x64   :  { %547 = vmatpush3.msra.mxu0 %v291_v42 }
  0x65   :  { %548 = vmatprep.subr.mxu0 %v290_v43 }
  0x66   :  { %549 = vmatpush3.msra.mxu0 %v290_v43 }
  0x67   :  { %550 = vmatprep.subr.mxu0 %v289_v44 }
  0x68   :  { %551 = vmatpush3.msra.mxu0 %v289_v44 }
  0x69   :  { %552 = vmatprep.subr.mxu0 %v288_v45 }
  0x6a   :  { %553 = vmatpush3.msra.mxu0 %v288_v45 }
  0x6b   :  { %554 = vmatprep.subr.mxu0 %v287_v53 }
  0x6c   :  { %555 = vmatpush3.msra.mxu0 %v287_v53 }
  0x6d   :  { %556 = vmatprep.subr.mxu0 %v286_v54 }
  0x6e   :  { %557 = vmatpush3.msra.mxu0 %v286_v54 }
  0x6f   :  { %558 = vmatprep.subr.mxu0 %v285_v55 }
  0x70   :  { %559 = vmatpush3.msra.mxu0 %v285_v55 }
  0x71   :  { %560 = vmatprep.subr.mxu0 %v284_v56 }
  0x72   :  { %561 = vmatpush3.msra.mxu0 %v284_v56 }
 0x112   :  { %v494_v47 = vpop.f32.mrf.mxu0 }
 0x113   :  { %v179_v48 = vadd.f32 %v494_v47, %v403_v46 }
 0x114   :  { %v173_v49 = vpop.f32.mrf.mxu0 }
 0x115   :  { %v174_v50 = vadd.f32 %v403_v46, %v173_v49  ;;  %v183_v52 = vmax.f32 %v179_v48, 0.0 }
 0x117   :  { %v182_v51 = vmax.f32 %v174_v50, 0.0 }
 0x119   :  { %527 = vmatprep.mubr.f32.mxu1 %v182_v51 }
 0x11a   :  { %528 = vmatmul.mubr.f32.vlgmr.msra.gmra.mxu1 %v183_v52 }
 0x1da   :  { %v529_v58 = vpop.f32.mrf.mxu1 }
 0x1db   :  { %v279_v59 = vadd.f32 %v529_v58, %v404_v57 }
 0x1dc   :  { %v273_v60 = vpop.f32.mrf.mxu1 }
 0x1dd   :  { %v274_v61 = vadd.f32 %v404_v57, %v273_v60  ;;  %v283_v63 = vmax.f32 %v279_v59, 0.0 }
 0x1df   :  { %v282_v62 = vmax.f32 %v274_v61, 0.0 }
 0x1e1   :  { %562 = vmatprep.mubr.f32.mxu0 %v282_v62 }
 0x1e2   :  { %563 = vmatmul.mubr.f32.vlgmr.msra.gmra.mxu0 %v283_v63 }
 0x2a2   :  { %v564_v1 = vpop.f32.mrf.mxu0 }
 0x2a3   :  { %v379_v2 = vadd.f32 %v564_v1, %v405_v0 }
 0x2a4   :  { %v373_v3 = vpop.f32.mrf.mxu0 }
 0x2a5   :  { %383 = vst [vmem:[#allocation10 + $0x8] sm:$0xff] %v379_v2  ;;  %v374_v4 = vadd.f32 %v405_v0, %v373_v3 }
 0x2a7   :  { %382 = vst [vmem:[#allocation10] sm:$0xff] %v374_v4 }
 0x2a8   :  { %663 = shalt.err (!%p660_p10)
}
 0x2a9   :  { %395 = dma.vmem_to_hbm [thread:$0]  %s390_s25, 256, %s773_s7, [#allocation4], %s682_s29, %s682_s29, %s683_s30  }
 0x2aa   :  { %678 = dma.done.wait [#allocation4], 256  }
 0x2ab   :  { %679 = vsyncadd [#allocation4], 4294967040 }
 0x2ac   :  { %399 = vsyncpa [#allocation3], 1 }
 0x2ad   :  { %400 = vsyncpa [#allocation6], 1 }
 0x2ae   :  { %401 = vsyncpa [#allocation9], 1 }
 0x2af   :  { %402 = vsyncpa [#allocation4], 1 }

// kernel: tpu_custom_call.1
= control target key start
LH: loop header
LB: loop body
LE: loop exit
PB: predicated region body
PF: predicated region fallthrough
CT: control target
= control target key end

     0   :  { %8 = vsyncpa [#allocation4], 0  ;;  %s355_s0 = inlined_call_operand.hbm [shape: f32[16,128], index: 0, kind: input, shape index: {}]   ;;  %s356_s1 = inlined_call_operand.hbm [shape: f32[128,128], index: 1, kind: input, shape index: {}]   ;;  %s357_s2 = inlined_call_operand.vmem [shape: f32[1,128], index: 2, kind: input, shape index: {}]   ;;  %s358_s3 = inlined_call_operand.hbm [shape: f32[16,128], index: 3, kind: output, shape index: {}]  }
   0x1   :  { %9 = vsyncpa [#allocation7], 0 }
   0x2   :  { %10 = vsyncpa [#allocation5], 0  ;;  %s309_s12 = smov [#allocation3]  }
   0x3   :  { %s16_s13 = sshll.u32 %s309_s12, 4  ;;  %s17_s13 = int_to_ptr.vmem [resolvable:$true] %s16_s13 }
   0x4   :  { %s251_s14 = scalar_lea.vmem %s17_s13, 256  ;;  %p256_p1 = scmp.lt.s32.totalorder %s17_s13, %s17_s13 }
   0x5   :  { %p252_p0 = scmp.ne.s32.totalorder %s17_s13, %s251_s14  ;;  %p257_p2 = scmp.lt.s32.totalorder %s251_s14, %s251_s14 }
   0x7   :  { %p258_p3 = por %p257_p2, %p256_p1 }
   0x9   :  { %p259_p4 = pnand %p258_p3, %p252_p0 }
   0xb   :  { %262 = shalt.err (!%p259_p4)
}
   0xc   :  { %s310_s15 = smov 128   ;;  %s311_s16 = smov 8  }
   0xd   :  { %22 = dma.hbm_to_vmem [thread:$0]  %s355_s0, 256, %s17_s13, [#allocation4], %s310_s15, %s310_s15, %s311_s16  }
   0xe   :  { %s312_s19 = smov [#allocation6]  }
   0xf   :  { %s28_s20 = sshll.u32 %s312_s19, 4  ;;  %s29_s20 = int_to_ptr.vmem [resolvable:$true] %s28_s20 }
  0x10   :  { %s271_s21 = scalar_lea.vmem %s29_s20, 2048  ;;  %p276_p6 = scmp.lt.s32.totalorder %s29_s20, %s29_s20 }
  0x11   :  { %p272_p5 = scmp.ne.s32.totalorder %s29_s20, %s271_s21  ;;  %p277_p7 = scmp.lt.s32.totalorder %s271_s21, %s271_s21 }
  0x13   :  { %p278_p8 = por %p277_p7, %p276_p6 }
  0x15   :  { %p279_p9 = pnand %p278_p8, %p272_p5 }
  0x17   :  { %282 = shalt.err (!%p279_p9)
}
  0x18   :  { %34 = dma.hbm_to_vmem [thread:$0]  %s356_s1, 2048, %s29_s20, [#allocation7], %s310_s15, %s310_s15, %s311_s16  }
  0x19   :  { %303 = dma.done.wait [#allocation4], 256  }
  0x1a   :  { %304 = vsyncadd [#allocation4], 4294967040 }
  0x1b   :  { %305 = dma.done.wait [#allocation7], 2048  }
  0x1c   :  { %306 = vsyncadd [#allocation7], 4294965248  ;;  %v68_v0 = vld [vmem:[#allocation6 + $0x78] sm:$0xff]  ;;  %v67_v1 = vld [vmem:[#allocation6 + $0x70] sm:$0xff]  ;;  %s313_s24 = smov [#allocation8]  }
  0x1d   :  { %203 = vmatprep.subr.mxu0 %v68_v0  ;;  %v66_v2 = vld [vmem:[#allocation6 + $0x68] sm:$0xff]  ;;  %v65_v3 = vld [vmem:[#allocation6 + $0x60] sm:$0xff]  ;;  %v51_v4 = vld [vmem:[#allocation3] sm:$0xff]  ;;  %s171_s25 = sshll.u32 %s313_s24, 4  ;;  %s172_s25 = int_to_ptr.vmem [resolvable:$true] %s171_s25 }
  0x1e   :  { %204 = vmatpush3.msra.mxu0 %v68_v0  ;;  %v64_v5 = vld [vmem:[#allocation6 + $0x58] sm:$0xff]  ;;  %235 = vmatprep.mubr.f32.mxu0 %v51_v4  ;;  %v63_v6 = vld [vmem:[#allocation6 + $0x50] sm:$0xff]  ;;  %v62_v7 = vld [vmem:[#allocation6 + $0x48] sm:$0xff]  ;;  %s283_s26 = scalar_lea.vmem %s172_s25, 256  ;;  %p288_p11 = scmp.lt.s32.totalorder %s172_s25, %s172_s25 }
  0x1f   :  { %205 = vmatprep.subr.mxu0 %v67_v1  ;;  %v61_v8 = vld [vmem:[#allocation6 + $0x40] sm:$0xff]  ;;  %v60_v9 = vld [vmem:[#allocation6 + $0x38] sm:$0xff]  ;;  %v59_v10 = vld [vmem:[#allocation6 + $0x30] sm:$0xff]  ;;  %p284_p10 = scmp.ne.s32.totalorder %s172_s25, %s283_s26  ;;  %p289_p12 = scmp.lt.s32.totalorder %s283_s26, %s283_s26 }
  0x20   :  { %206 = vmatpush3.msra.mxu0 %v67_v1  ;;  %v58_v11 = vld [vmem:[#allocation6 + $0x28] sm:$0xff]  ;;  %v57_v12 = vld [vmem:[#allocation6 + $0x20] sm:$0xff]  ;;  %v56_v13 = vld [vmem:[#allocation6 + $0x18] sm:$0xff] }
  0x21   :  { %207 = vmatprep.subr.mxu0 %v66_v2  ;;  %v55_v14 = vld [vmem:[#allocation6 + $0x10] sm:$0xff]  ;;  %v54_v15 = vld [vmem:[#allocation6 + $0x8] sm:$0xff]  ;;  %v53_v16 = vld [vmem:[#allocation6] sm:$0xff]  ;;  %p290_p13 = por %p289_p12, %p288_p11 }
  0x22   :  { %208 = vmatpush3.msra.mxu0 %v66_v2  ;;  %v52_v17 = vld [vmem:[#allocation3 + $0x8] sm:$0xff]  ;;  %v184_v18 = vld [vmem:[%s357_s2] ss:$0 sm:$0xff] }
  0x23   :  { %209 = vmatprep.subr.mxu0 %v65_v3  ;;  %p291_p0 = pnand %p290_p13, %p284_p10 }
  0x24   :  { %210 = vmatpush3.msra.mxu0 %v65_v3 }
  0x25   :  { %211 = vmatprep.subr.mxu0 %v64_v5 }
  0x26   :  { %212 = vmatpush3.msra.mxu0 %v64_v5 }
  0x27   :  { %213 = vmatprep.subr.mxu0 %v63_v6 }
  0x28   :  { %214 = vmatpush3.msra.mxu0 %v63_v6 }
  0x29   :  { %215 = vmatprep.subr.mxu0 %v62_v7 }
  0x2a   :  { %216 = vmatpush3.msra.mxu0 %v62_v7 }
  0x2b   :  { %217 = vmatprep.subr.mxu0 %v61_v8 }
  0x2c   :  { %218 = vmatpush3.msra.mxu0 %v61_v8 }
  0x2d   :  { %219 = vmatprep.subr.mxu0 %v60_v9 }
  0x2e   :  { %220 = vmatpush3.msra.mxu0 %v60_v9 }
  0x2f   :  { %221 = vmatprep.subr.mxu0 %v59_v10 }
  0x30   :  { %222 = vmatpush3.msra.mxu0 %v59_v10 }
  0x31   :  { %223 = vmatprep.subr.mxu0 %v58_v11 }
  0x32   :  { %224 = vmatpush3.msra.mxu0 %v58_v11 }
  0x33   :  { %225 = vmatprep.subr.mxu0 %v57_v12 }
  0x34   :  { %226 = vmatpush3.msra.mxu0 %v57_v12 }
  0x35   :  { %227 = vmatprep.subr.mxu0 %v56_v13 }
  0x36   :  { %228 = vmatpush3.msra.mxu0 %v56_v13 }
  0x37   :  { %229 = vmatprep.subr.mxu0 %v55_v14 }
  0x38   :  { %230 = vmatpush3.msra.mxu0 %v55_v14 }
  0x39   :  { %231 = vmatprep.subr.mxu0 %v54_v15 }
  0x3a   :  { %232 = vmatpush3.msra.mxu0 %v54_v15 }
  0x3b   :  { %233 = vmatprep.subr.mxu0 %v53_v16 }
  0x3c   :  { %234 = vmatpush3.msra.mxu0 %v53_v16 }
  0x3d   :  { %236 = vmatmul.mubr.f32.vlgmr.msra.gmra.mxu0 %v52_v17 }
  0xfd   :  { %v237_v19 = vpop.f32.mrf.mxu0 }
  0xfe   :  { %v161_v20 = vadd.f32 %v237_v19, %v184_v18 }
  0xff   :  { %v135_v21 = vpop.f32.mrf.mxu0 }
 0x100   :  { %v163_v22 = vmax.f32 %v161_v20, 0.0  ;;  %v160_v23 = vadd.f32 %v184_v18, %v135_v21 }
 0x102   :  { %165 = vst [vmem:[#allocation8 + $0x8] sm:$0xff] %v163_v22  ;;  %v162_v24 = vmax.f32 %v160_v23, 0.0 }
 0x104   :  { %164 = vst [vmem:[#allocation8] sm:$0xff] %v162_v24 }
 0x105   :  { %294 = shalt.err (!%p291_p0)
}
 0x106   :  { %177 = dma.vmem_to_hbm [thread:$0]  %s172_s25, 256, %s358_s3, [#allocation5], %s310_s15, %s310_s15, %s311_s16  }
 0x107   :  { %307 = dma.done.wait [#allocation5], 256  }
 0x108   :  { %308 = vsyncadd [#allocation5], 4294967040 }
 0x109   :  { %181 = vsyncpa [#allocation4], 1 }
 0x10a   :  { %182 = vsyncpa [#allocation7], 1 }
 0x10b   :  { %183 = vsyncpa [#allocation5], 1 }

</bundles_post_ra>
